<compile_context>
chip_gen: v7x
topology: tpu7x:2x2x1
jax: 0.10.0
libtpu: 0.0.40
codegen_flags: <defaults>
</compile_context>

<pallas_src>
import math

import jax
import jax.numpy as jnp
from jax.experimental import pallas as pl
from jax.experimental.pallas import tpu as pltpu


def _copy_kernel(x_ref, o_ref):
    # Identity copy of one lane-dense (block_rows, cols) tile.
    o_ref[...] = x_ref[...]


_LANE = 128
_BLOCK_CAP_BYTES = 4 * 1024 * 1024  # per-block cap, sized against v7x VMEM


def _plan_layout(total_elems, itemsize):
    """Pick a lane-dense 2D factorization (rows, cols, sublane) of the flat data.

    Returns None when no multiple-of-128 factorization exists (then we skip
    the kernel and do a metadata-only reshape, which is what torch .view does
    anyway).
    """
    if total_elems % _LANE != 0:
        return None
    # sublane count per vreg row: 8 for f32, 16 for bf16, 32 for int8.
    sublane = max(8, (32 // (itemsize * 8)) * 8)
    fallback = None
    for cols in (2048, 1024, 512, 256, 128):
        if total_elems % cols:
            continue
        rows = total_elems // cols
        if rows % sublane == 0:
            return rows, cols, sublane  # widest lane-dense + sublane-aligned
        if fallback is None:
            fallback = (rows, cols, sublane)
    return fallback


def _pallas_identity_copy(x2d, rows, cols, sublane):
    itemsize = jnp.dtype(x2d.dtype).itemsize
    max_rows_by_cap = max(1, _BLOCK_CAP_BYTES // (cols * itemsize))
    if rows <= max_rows_by_cap:
        block_rows = rows
    else:
        block_rows = max(sublane, (max_rows_by_cap // sublane) * sublane)
    num_blocks = pl.cdiv(rows, block_rows)

    return pl.pallas_call(
        _copy_kernel,
        out_shape=jax.ShapeDtypeStruct((rows, cols), x2d.dtype),
        grid=(num_blocks,),
        in_specs=[pl.BlockSpec((block_rows, cols), lambda i: (i, 0))],
        out_specs=pl.BlockSpec((block_rows, cols), lambda i: (i, 0)),
        input_output_aliases={0: 0},
        compiler_params=pltpu.CompilerParams(
            dimension_semantics=("parallel",),
        ),
        cost_estimate=pl.CostEstimate(
            flops=0,
            transcendentals=0,
            bytes_accessed=2 * rows * cols * itemsize,
        ),
    )(x2d)


class Reshape:
    """JAX/Pallas port of unified_path.models.modules.Reshape."""

    def __init__(self, shape):
        self.shape = tuple(int(s) for s in shape)

    def __call__(self, x):
        return self.forward(x)

    def forward(self, x):
        batch = x.shape[0]
        n_in = math.prod(x.shape[1:])
        n_out = math.prod(self.shape)
        if n_in != n_out:
            raise ValueError(
                f"cannot view input of shape {x.shape} as {(batch,) + self.shape}"
            )

        total = batch * n_in
        plan = _plan_layout(total, jnp.dtype(x.dtype).itemsize)

        if plan is None:
            # No lane-dense factorization: the reshape is metadata-only in XLA
            # (exactly like torch .view on a contiguous tensor) — running a
            # copy kernel here would only add HBM traffic.
            return x.reshape((batch,) + self.shape)

        rows, cols, sublane = plan
        # Row-major flatten (torch .view on a contiguous tensor), presented as
        # a lane-dense slab; batch is folded into the row dimension so small
        # batches don't force sub-8-row masked stores.
        x2d = x.reshape(rows, cols)
        out2d = _pallas_identity_copy(x2d, rows, cols, sublane)

        # Metadata-only target reshape (glue), matching torch view semantics.
        return out2d.reshape((batch,) + self.shape)

    def logdet(self, x):
        return 0.0


if __name__ == "__main__":
    key = jax.random.PRNGKey(0)
    # Small NCHW input: batch=2, channels=4, spatial=16x16.
    x = jax.random.normal(key, (2, 4, 16, 16), dtype=jnp.float32)

    # Reshape (4, 16, 16) -> (16, 64), preserving batch dim.
    mod = Reshape((16, 64))
    y = mod(x)
    y = jax.block_until_ready(y)

    # Reference: plain row-major reshape (== torch .view on contiguous tensor).
    ref = x.reshape((x.shape[0], 16, 64))

    assert y.shape == (2, 16, 64), y.shape
    assert y.dtype == x.dtype
    assert jnp.array_equal(y, ref), "Pallas reshape mismatch vs reference"
    assert mod.logdet(x) == 0.0

    # Second check on a larger, multi-block shape to exercise the tiled grid.
    x2 = jax.random.normal(key, (4, 8, 64, 128), dtype=jnp.float32)
    mod2 = Reshape((64, 1024))
    y2 = jax.block_until_ready(mod2(x2))
    assert jnp.array_equal(y2, x2.reshape((4, 64, 1024)))

    print("KERNEL_OK")
</pallas_src>

<mosaic_0001>
module attributes {stable_mosaic.version = 11 : i64} {
  func.func @_copy_kernel(%arg0: i32, %arg1: memref<8x256xf32, #tpu.memory_space<vmem>>, %arg2: memref<8x256xf32, #tpu.memory_space<vmem>>) attributes {dimension_semantics = [#tpu.dimension_semantics<parallel>], iteration_bounds = array<i64: 1>, scalar_prefetch = 0 : i64, scratch_operands = 0 : i64, tpu.core_type = #tpu.core_type<tc>, window_params = [{transform_indices = @transform_0, window_bounds = array<i64: 8, 256>}, {transform_indices = @transform_1, window_bounds = array<i64: 8, 256>}]} {
    %c0 = arith.constant 0 : index
    %c0_0 = arith.constant 0 : index
    %0 = vector.load %arg1[%c0, %c0_0] : memref<8x256xf32, #tpu.memory_space<vmem>>, vector<8x256xf32>
    %c0_1 = arith.constant 0 : index
    %c0_2 = arith.constant 0 : index
    %1 = vector.load %arg2[%c0_1, %c0_2] : memref<8x256xf32, #tpu.memory_space<vmem>>, vector<8x256xf32>
    tpu.vector_store %arg2[%c0_1, %c0_2], %0 {strides = array<i32>} : memref<8x256xf32, #tpu.memory_space<vmem>>, vector<8x256xf32>,
    return
  }
  func.func @transform_0(%arg0: i32) -> (i32, i32) {
    %c0_i32 = arith.constant 0 : i32
    %c0_i32_0 = arith.constant 0 : i32
    return %arg0, %c0_i32 : i32, i32
  }
  func.func @transform_1(%arg0: i32) -> (i32, i32) {
    %c0_i32 = arith.constant 0 : i32
    %c0_i32_0 = arith.constant 0 : i32
    return %arg0, %c0_i32 : i32, i32
  }
}

</mosaic_0001>

<bundles_post_ra>
// kernel: tpu_custom_call.1
= control target key start
LH: loop header
LB: loop body
LE: loop exit
PB: predicated region body
PF: predicated region fallthrough
CT: control target
= control target key end

     0   :  { %6 = vsyncpa [#allocation3], 0  ;;  %s126_s0 = inlined_call_operand.hbm [shape: f32[8,256], index: 0, kind: input, shape index: {}, may-alias: {0,1}]   ;;  %s127_s1 = inlined_call_operand.hbm [shape: f32[8,256], index: 1, kind: output, shape index: {}, may-alias: {0,1}]  }
   0x1   :  { %7 = vsyncpa [#allocation4], 0  ;;  %s90_s6 = smov [#allocation2]   ;;  %s42_s10 = scalar_lea.hbm %s126_s0, 256 }
   0x2   :  { %s14_s7 = sshll.u32 %s90_s6, 4  ;;  %p43_p0 = scmp.ne.s32.totalorder %s126_s0, %s42_s10  ;;  %s15_s7 = int_to_ptr.vmem [resolvable:$true] %s14_s7 }
   0x3   :  { %p46_p1 = scmp.lt.u32.totalorder %s42_s10, %s126_s0 }
   0x5   :  { %p48_p2 = pnand %p46_p1, %p43_p0 }
   0x7   :  { %51 = shalt.err (!%p48_p2)
}
   0x8   :  { %s52_s15 = scalar_lea.vmem %s15_s7, 256  ;;  %p57_p4 = scmp.lt.s32.totalorder %s15_s7, %s15_s7 }
   0x9   :  { %p53_p3 = scmp.ne.s32.totalorder %s15_s7, %s52_s15  ;;  %p58_p5 = scmp.lt.s32.totalorder %s52_s15, %s52_s15 }
   0xb   :  { %p59_p6 = por %p58_p5, %p57_p4 }
   0xd   :  { %p60_p7 = pnand %p59_p6, %p53_p3 }
   0xf   :  { %63 = shalt.err (!%p60_p7)
}
  0x10   :  { %17 = dma.hbm_to_vmem [thread:$0]  %s126_s0, 256, %s15_s7, [#allocation3]  }
  0x11   :  { %86 = dma.done.wait [#allocation3], 256  }
  0x12   :  { %87 = vsyncadd [#allocation3], 4294967040  ;;  %s91_s18 = smov [#allocation5]   ;;  %v21_v0 = vld [vmem:[#allocation2] sm:$0xff]  ;;  %v22_v1 = vld [vmem:[#allocation2 + $0x8] sm:$0xff] }
  0x13   :  { %s31_s19 = sshll.u32 %s91_s18, 4  ;;  %23 = vst [vmem:[#allocation5] sm:$0xff] %v21_v0  ;;  %24 = vst [vmem:[#allocation5 + $0x8] sm:$0xff] %v22_v1  ;;  %s32_s19 = int_to_ptr.vmem [resolvable:$true] %s31_s19 }
  0x14   :  { %s64_s20 = scalar_lea.vmem %s32_s19, 256  ;;  %p69_p9 = scmp.lt.s32.totalorder %s32_s19, %s32_s19 }
  0x15   :  { %p65_p8 = scmp.ne.s32.totalorder %s32_s19, %s64_s20  ;;  %p70_p10 = scmp.lt.s32.totalorder %s64_s20, %s64_s20 }
  0x17   :  { %p71_p11 = por %p70_p10, %p69_p9 }
  0x19   :  { %p72_p12 = pnand %p71_p11, %p65_p8 }
  0x1b   :  { %75 = shalt.err (!%p72_p12)
}
  0x1c   :  { %s76_s0 = scalar_lea.hbm %s127_s1, 256 }
  0x1d   :  { %p77_p13 = scmp.ne.s32.totalorder %s127_s1, %s76_s0  ;;  %p80_p0 = scmp.lt.u32.totalorder %s76_s0, %s127_s1 }
  0x1f   :  { %p82_p1 = pnand %p80_p0, %p77_p13 }
  0x21   :  { %85 = shalt.err (!%p82_p1)
}
  0x22   :  { %34 = dma.vmem_to_hbm [thread:$0]  %s32_s19, 256, %s127_s1, [#allocation4]  }
  0x23   :  { %88 = dma.done.wait [#allocation4], 256  }
  0x24   :  { %89 = vsyncadd [#allocation4], 4294967040 }
  0x25   :  { %38 = vsyncpa [#allocation3], 1 }
  0x26   :  { %39 = vsyncpa [#allocation4], 1 }

</bundles_post_ra>
